<compile_context>
chip_gen: v7x
topology: tpu7x:2x2x1
jax: 0.10.0
libtpu: 0.0.40
codegen_flags: <defaults>
</compile_context>

<pallas_src>
import functools

import jax
import jax.numpy as jnp
from jax import lax
from jax.experimental import pallas as pl
from jax.experimental.pallas import tpu as pltpu


# ----------------------------- projection kernel ----------------------------

def _proj_kernel(x_ref, w_ref, h_ref):
    # h = x @ W_all (all heads fused along the output dim).  bf16 operands feed
    # the MXU at native rate on v6e/v7x; accumulation stays f32.
    x = x_ref[...].astype(jnp.bfloat16)
    w = w_ref[...].astype(jnp.bfloat16)
    h_ref[...] = jnp.dot(x, w, preferred_element_type=jnp.float32)


def project(x, w_all, *, tm=128):
    n, fin = x.shape
    hf = w_all.shape[1]
    tm = min(tm, n)
    assert n % tm == 0
    return pl.pallas_call(
        _proj_kernel,
        out_shape=jax.ShapeDtypeStruct((n, hf), jnp.float32),
        grid=(n // tm,),
        in_specs=[
            pl.BlockSpec((tm, fin), lambda i: (i, 0)),
            pl.BlockSpec((fin, hf), lambda i: (0, 0)),   # constant -> not re-DMA'd
        ],
        out_specs=pl.BlockSpec((tm, hf), lambda i: (i, 0)),
        compiler_params=pltpu.CompilerParams(dimension_semantics=("parallel",)),
    )(x, w_all)


# ----------------------------- attention kernel -----------------------------

def _attn_kernel(hrow_ref, hcol_ref, adj_ref, asrc_ref, adstT_ref, out_ref,
                 num_acc, rs_acc, *, nheads, fout, alpha, apply_log_softmax):
    """Fused multi-head sparse attention over one (row-block, col-block) tile.

    edge_e = exp(-LeakyReLU(a_src.h_i + a_dst.h_j)) on edges of adj
    h'_i   = (sum_j edge_e * h_j) / (sum_j edge_e)     (per head, then concat)
    plus ELU (both layers) and optional log_softmax (output layer).
    """
    j = pl.program_id(1)

    @pl.when(j == 0)
    def _init():
        num_acc[...] = jnp.zeros_like(num_acc)
        rs_acc[...] = jnp.zeros_like(rs_acc)

    h_row = hrow_ref[...]                               # (TM, H*Fout) f32, resident across j
    h_col = hcol_ref[...]                               # (TN, H*Fout) f32, streamed
    edge = adj_ref[...] != 0                            # (TM, TN) bool (adj is int8)

    # Per-head attention logits via block-diagonal score matrices (one fused
    # matmul each instead of 2*H tiny K=Fout dot_generals):
    #   s1[:, h] = a_src_h . h_i(head h)    s2[h, :] = a_dst_h . h_j(head h)
    s1 = jnp.dot(h_row, asrc_ref[...], preferred_element_type=jnp.float32)    # (TM, H)
    s2 = lax.dot_general(adstT_ref[...], h_col, (((1,), (1,)), ((), ())),
                         preferred_element_type=jnp.float32)                  # (H, TN)

    h_col_bf = h_col.astype(jnp.bfloat16)
    num_updates = []
    rs_updates = []
    for hh in range(nheads):                            # unrolled: nheads is small & static
        s = s1[:, hh:hh + 1] + s2[hh:hh + 1, :]         # (TM, TN)
        lrelu = jnp.where(s > 0.0, s, alpha * s)        # LeakyReLU (f32, VPU)
        # mask folded into the exp: non-edges never produce inf -> no NaN.
        e = jnp.where(edge, jnp.exp(-lrelu), 0.0)       # (TM, TN) f32
        rs_updates.append(jnp.sum(e, axis=1, keepdims=True))                  # (TM, 1)
        num_updates.append(                             # bf16 MXU matmul, f32 accum
            jnp.dot(e.astype(jnp.bfloat16),
                    h_col_bf[:, hh * fout:(hh + 1) * fout],
                    preferred_element_type=jnp.float32))                      # (TM, Fout)

    rs_acc[...] += (jnp.concatenate(rs_updates, axis=1)
                    if nheads > 1 else rs_updates[0])
    num_acc[...] += (jnp.concatenate(num_updates, axis=1)
                     if nheads > 1 else num_updates[0])

    @pl.when(j == pl.num_programs(1) - 1)
    def _finalize():
        rs = rs_acc[...]                                 # (TM, H)
        # EUP reciprocal instead of N*Fout divides; guard zero-degree rows.
        inv = jnp.where(rs > 0.0, pl.reciprocal(rs, approx=True), 0.0)
        num = num_acc[...]                               # (TM, H*Fout)
        if nheads > 1:
            out = jnp.concatenate(
                [num[:, hh * fout:(hh + 1) * fout] * inv[:, hh:hh + 1]
                 for hh in range(nheads)], axis=1)
        else:
            out = num * inv
        # ELU(alpha=1): heads apply it inside the layer (concat=True), the
        # output layer gets F.elu in SpGAT.forward -> always applied here.
        out = jnp.where(out > 0.0, out, jnp.exp(out) - 1.0)
        if apply_log_softmax:                            # log_softmax over dim=1
            m = jnp.max(out, axis=1, keepdims=True)
            out = out - (m + jnp.log(jnp.sum(jnp.exp(out - m), axis=1, keepdims=True)))
        out_ref[...] = out.astype(out_ref.dtype)         # single lane-dense store


def sp_attention(h, adj_i8, a_src, a_dst_t, *, nheads, fout, alpha,
                 apply_log_softmax=False, tm=128, tn=128):
    n, hf = h.shape
    assert hf == nheads * fout
    tm = min(tm, n)
    tn = min(tn, n)
    assert n % tm == 0 and n % tn == 0
    kern = functools.partial(_attn_kernel, nheads=nheads, fout=fout,
                             alpha=alpha, apply_log_softmax=apply_log_softmax)
    return pl.pallas_call(
        kern,
        out_shape=jax.ShapeDtypeStruct((n, hf), jnp.float32),
        grid=(n // tm, n // tn),                 # rows parallel x cols (reduction) arbitrary
        in_specs=[
            pl.BlockSpec((tm, hf), lambda i, j: (i, 0)),     # h row block (resident over j)
            pl.BlockSpec((tn, hf), lambda i, j: (j, 0)),     # h col block (streamed)
            pl.BlockSpec((tm, tn), lambda i, j: (i, j)),     # int8 adj tile (streamed)
            pl.BlockSpec(a_src.shape, lambda i, j: (0, 0)),  # (H*Fout, H) block-diag a_src
            pl.BlockSpec(a_dst_t.shape, lambda i, j: (0, 0)),  # (H, H*Fout) block-diag a_dst
        ],
        out_specs=pl.BlockSpec((tm, hf), lambda i, j: (i, 0)),
        scratch_shapes=[pltpu.VMEM((tm, hf), jnp.float32),      # numerator accumulator
                        pltpu.VMEM((tm, nheads), jnp.float32)],  # rowsum accumulator
        compiler_params=pltpu.CompilerParams(
            dimension_semantics=("parallel", "arbitrary")),
    )(h, h, adj_i8, a_src, a_dst_t)


# ----------------------------- parameter setup ------------------------------

def _xavier_normal(key, shape, gain):
    fan_in, fan_out = shape
    std = gain * jnp.sqrt(2.0 / (fan_in + fan_out))
    return std * jax.random.normal(key, shape, dtype=jnp.float32)


def init_spgat_params(key, nfeat, nhid, nclass, nheads):
    gain = 1.414
    heads = []
    for _ in range(nheads):
        key, k_w, k_a = jax.random.split(key, 3)
        W = _xavier_normal(k_w, (nfeat, nhid), gain)                     # (nfeat, nhid)
        a = _xavier_normal(k_a, (1, 2 * nhid), gain).reshape(2, nhid)    # [a_src; a_dst]
        heads.append((W, a))
    key, k_w, k_a = jax.random.split(key, 3)
    Wo = _xavier_normal(k_w, (nhid * nheads, nclass), gain)
    ao = _xavier_normal(k_a, (1, 2 * nclass), gain).reshape(2, nclass)
    return {"heads": heads, "out": (Wo, ao)}


def _pack_heads(heads):
    """Fuse per-head params: W_all (Fin, H*Fout) + block-diagonal score mats."""
    nheads = len(heads)
    fout = heads[0][0].shape[1]
    W_all = jnp.concatenate([W for (W, _) in heads], axis=1)             # (Fin, H*Fout)
    a_src = jnp.zeros((nheads * fout, nheads), dtype=jnp.float32)
    a_dst_t = jnp.zeros((nheads, nheads * fout), dtype=jnp.float32)
    for hh, (_, a) in enumerate(heads):
        a_src = a_src.at[hh * fout:(hh + 1) * fout, hh].set(a[0])
        a_dst_t = a_dst_t.at[hh, hh * fout:(hh + 1) * fout].set(a[1])
    return W_all, a_src, a_dst_t


# ------------------------------ SpGAT forward --------------------------------

def spgat_forward(params, x, adj_i8, *, alpha, tm=128, tn=128):
    # F.dropout(x) -> identity (eval mode).
    heads = params["heads"]
    nheads = len(heads)
    nhid = heads[0][0].shape[1]
    W_all, a_src, a_dst_t = _pack_heads(heads)

    # Layer 1: all heads fused -> one projection kernel + one attention kernel.
    # adj is streamed from HBM exactly once for all nheads heads.
    h1 = project(x, W_all, tm=tm)                                        # (N, H*nhid)
    z1 = sp_attention(h1, adj_i8, a_src, a_dst_t, nheads=nheads, fout=nhid,
                      alpha=alpha, apply_log_softmax=False, tm=tm, tn=tn)

    # F.dropout(z1) -> identity (eval mode).
    # Output layer (concat=False) + ELU + log_softmax fused into its finalize.
    Wo, ao = params["out"]
    nclass = Wo.shape[1]
    h2 = project(z1, Wo, tm=tm)                                          # (N, nclass)
    return sp_attention(h2, adj_i8,
                        ao[0].reshape(-1, 1),       # (nclass, 1)
                        ao[1].reshape(1, -1),       # (1, nclass)
                        nheads=1, fout=nclass, alpha=alpha,
                        apply_log_softmax=True, tm=tm, tn=tn)            # (N, nclass)


if __name__ == "__main__":
    # Small shapes consistent with the module's forward; N=256 with 128x128
    # tiles exercises the 2x2 attention grid (parallel rows, accumulated cols).
    N, nfeat, nhid, nclass, nheads = 256, 64, 8, 8, 4
    alpha = 0.2
    dropout = 0.6  # unused (eval mode)

    key = jax.random.PRNGKey(0)
    k_x, k_adj, k_params = jax.random.split(key, 3)

    x = jax.random.normal(k_x, (N, nfeat), dtype=jnp.float32)
    # adj as int8 mask (4x less HBM/VMEM traffic than f32), with self-loops so
    # every row has a nonzero degree.
    adj = (jax.random.uniform(k_adj, (N, N)) < 0.3).astype(jnp.int8)
    adj = jnp.maximum(adj, jnp.eye(N, dtype=jnp.int8))

    params = init_spgat_params(k_params, nfeat, nhid, nclass, nheads)

    out = spgat_forward(params, x, adj, alpha=alpha, tm=128, tn=128)
    out = jax.block_until_ready(out)

    assert out.shape == (N, nclass)
    assert bool(jnp.all(jnp.isfinite(out)))
    print("KERNEL_OK")
</pallas_src>

<mosaic_0001>
module attributes {stable_mosaic.version = 11 : i64} {
  func.func @_proj_kernel(%arg0: i32, %arg1: memref<128x64xf32, #tpu.memory_space<vmem>>, %arg2: memref<64x32xf32, #tpu.memory_space<vmem>>, %arg3: memref<128x32xf32, #tpu.memory_space<vmem>>) attributes {dimension_semantics = [#tpu.dimension_semantics<parallel>], iteration_bounds = array<i64: 2>, scalar_prefetch = 0 : i64, scratch_operands = 0 : i64, tpu.core_type = #tpu.core_type<tc>, window_params = [{transform_indices = @transform_0, window_bounds = array<i64: 128, 64>}, {pipeline_mode = #tpu.pipeline_mode<synchronous>, transform_indices = @transform_1, window_bounds = array<i64: 64, 32>}, {transform_indices = @transform_2, window_bounds = array<i64: 128, 32>}]} {
    %c0 = arith.constant 0 : index
    %c0_0 = arith.constant 0 : index
    %0 = vector.load %arg1[%c0, %c0_0] : memref<128x64xf32, #tpu.memory_space<vmem>>, vector<128x64xf32>
    %1 = arith.truncf %0 : vector<128x64xf32> to vector<128x64xbf16>
    %c0_1 = arith.constant 0 : index
    %c0_2 = arith.constant 0 : index
    %2 = vector.load %arg2[%c0_1, %c0_2] : memref<64x32xf32, #tpu.memory_space<vmem>>, vector<64x32xf32>
    %3 = arith.truncf %2 : vector<64x32xf32> to vector<64x32xbf16>
    %cst = arith.constant dense<0.000000e+00> : vector<128x32xf32>
    %4 = tpu.matmul %1, %3, %cst {dimension_numbers = #tpu.dot_dimension_numbers<[1], [0], [0], [1], [0, 0, 1, 1], [], []>} : vector<128x64xbf16>, vector<64x32xbf16>, vector<128x32xf32> -> vector<128x32xf32>
    %c0_3 = arith.constant 0 : index
    %c0_4 = arith.constant 0 : index
    %5 = vector.load %arg3[%c0_3, %c0_4] : memref<128x32xf32, #tpu.memory_space<vmem>>, vector<128x32xf32>
    tpu.vector_store %arg3[%c0_3, %c0_4], %4 {strides = array<i32>} : memref<128x32xf32, #tpu.memory_space<vmem>>, vector<128x32xf32>,
    return
  }
  func.func @transform_0(%arg0: i32) -> (i32, i32) {
    %c0_i32 = arith.constant 0 : i32
    %c0_i32_0 = arith.constant 0 : i32
    return %arg0, %c0_i32 : i32, i32
  }
  func.func @transform_1(%arg0: i32) -> (i32, i32) {
    %c0_i32 = arith.constant 0 : i32
    %c0_i32_0 = arith.constant 0 : i32
    %c0_i32_1 = arith.constant 0 : i32
    return %c0_i32, %c0_i32_0 : i32, i32
  }
  func.func @transform_2(%arg0: i32) -> (i32, i32) {
    %c0_i32 = arith.constant 0 : i32
    %c0_i32_0 = arith.constant 0 : i32
    return %arg0, %c0_i32 : i32, i32
  }
}

</mosaic_0001>

<bundles_post_ra>
// kernel: tpu_custom_call.1
= control target key start
LH: loop header
LB: loop body
LE: loop exit
PB: predicated region body
PF: predicated region fallthrough
CT: control target
= control target key end

     0   :  { %s473_s9 = smov 0   ;;  %s581_s0 = inlined_call_operand.vmem [shape: f32[256,64], index: 0, kind: input, shape index: {}]   ;;  %s582_s1 = inlined_call_operand.vmem [shape: f32[64,32], index: 1, kind: input, shape index: {}]   ;;  %s583_s2 = inlined_call_operand.vmem [shape: f32[256,32], index: 2, kind: output, shape index: {}]  }
   0x1 LB: > { %s379_s10 = sadd.s32 4294967295, %s456_s9   ;;  %p383_p0 = scmp.ge.s32.totalorder %s456_s9, 1  ;;  %s456_s9 = sphi %s473_s9, %s12_s9  }
   0x2   : > { %p113_p1 = scmp.lt.s32.totalorder %s456_s9, 3 }
   0x4   : > { %p114_p2 = pnand %p383_p0, %p113_p1 }
   0x5   : > { %v172_v0 = vld [vmem:[%s582_s1] sm:$0xff] (!%p114_p2)  ;;  %v173_v1 = vld [vmem:[%s582_s1 + $0x8] sm:$0xff] (!%p114_p2)  ;;  %v174_v2 = vld [vmem:[%s582_s1 + $0x10] sm:$0xff] (!%p114_p2)  ;;  %s384_s17 = sshll.u32 (!%p114_p2), %s379_s10, 4  ;;  %vm184_vm0 = vcmask (!%p114_p2), 523264   ;;  %vm306_vm1 = vcmask (!%p114_p2), 261120  }
   0x6   : > { %117 = sbr.rel (%p114_p2) target bundleno = 248 (0xf8), region = 28  ;;  %v180_v3 = vpack.c.bf16 (!%p114_p2), %v173_v1, %v172_v0  ;;  %v175_v4 = vld [vmem:[%s582_s1 + $0x18] sm:$0xff] (!%p114_p2)  ;;  %p136_p3 = scmp.lt.s32.totalorder (!%p114_p2), %s384_s17, 31  ;;  %v176_v6 = vld [vmem:[%s582_s1 + $0x20] sm:$0xff] (!%p114_p2)  ;;  %v177_v7 = vld [vmem:[%s582_s1 + $0x28] sm:$0xff] (!%p114_p2) }
   0x7   : > { %v181_v5 = vpack.c.bf16 (!%p114_p2), %v175_v4, %v174_v2  ;;  %v182_v8 = vpack.c.bf16 (!%p114_p2), %v177_v7, %v176_v6  ;;  %v178_v9 = vld [vmem:[%s582_s1 + $0x30] sm:$0xff] (!%p114_p2)  ;;  %v179_v10 = vld [vmem:[%s582_s1 + $0x38] sm:$0xff] (!%p114_p2) }
   0x8   : > { %410 = vmatprep.subr.bf16.mxu0 (!%p114_p2), %v180_v3  ;;  %434 = vmatprep.subr.bf16.mxu1 (!%p114_p2), %v180_v3  ;;  %v183_v16 = vpack.c.bf16 (!%p114_p2), %v179_v10, %v178_v9 }
   0x9   : > { %411 = vmatpush3.bf16.msra.mxu0 (!%p114_p2), %v180_v3  ;;  %438 = vmatpush3.bf16.msra.mxu1 (!%p114_p2), %v180_v3 }
   0xa   : > { %412 = vmatprep.subr.bf16.mxu0 (!%p114_p2), %v181_v5  ;;  %435 = vmatprep.subr.bf16.mxu1 (!%p114_p2), %v181_v5 }
   0xd   : > { %s585_s17 = smov (!%p136_p3, %s384_s17), 31  ;;  %413 = vmatpush3.bf16.msra.mxu0 %v181_v5  ;;  %439 = vmatpush3.bf16.msra.mxu1 %v181_v5 }
   0xe   : > { %s385_s24 = sshll.u32 %s585_s17, 3  ;;  %414 = vmatprep.subr.bf16.mxu0 %v182_v8  ;;  %436 = vmatprep.subr.bf16.mxu1 %v182_v8 }
   0xf   : > { %s513_s3 = scalar_lea.vmem %s581_s0, %s385_s24  ;;  %s544_s6 = scalar_lea.vmem %s583_s2, %s385_s24 }
  0x10   : > { %v148_v11 = vld [vmem:[%s513_s3] sm:$0xff]  ;;  %v149_v12 = vld [vmem:[%s513_s3 + $0x8] sm:$0xff]  ;;  %v150_v18 = vld [vmem:[%s513_s3 + $0x10] sm:$0xff] }
  0x11   : > { %v156_v13 = vld [vmem:[%s513_s3 + $0x40] sm:$0xff]  ;;  %v164_v14 = vpack.c.bf16 %v149_v12, %v148_v11  ;;  %v157_v15 = vld [vmem:[%s513_s3 + $0x48] sm:$0xff]  ;;  %v151_v19 = vld [vmem:[%s513_s3 + $0x18] sm:$0xff]  ;;  %415 = vmatpush3.bf16.msra.mxu0 %v182_v8  ;;  %440 = vmatpush3.bf16.msra.mxu1 %v182_v8 }
  0x12   : > { %v168_v17 = vpack.c.bf16 %v157_v15, %v156_v13  ;;  %v158_v20 = vld [vmem:[%s513_s3 + $0x50] sm:$0xff]  ;;  %v159_v21 = vld [vmem:[%s513_s3 + $0x58] sm:$0xff]  ;;  %v152_v22 = vld [vmem:[%s513_s3 + $0x20] sm:$0xff]  ;;  %416 = vmatprep.subr.bf16.mxu0 %v183_v16  ;;  %437 = vmatprep.subr.bf16.mxu1 %v183_v16  ;;  %v165_v26 = vpack.c.bf16 %v151_v19, %v150_v18 }
  0x13   : > { %418 = vmatprep.mubr.msk.bf16.mxu0 %vm184_vm0, %v164_v14  ;;  %v153_v23 = vld [vmem:[%s513_s3 + $0x28] sm:$0xff]  ;;  %v160_v24 = vld [vmem:[%s513_s3 + $0x60] sm:$0xff]  ;;  %v169_v27 = vpack.c.bf16 %v159_v21, %v158_v20  ;;  %v154_v30 = vld [vmem:[%s513_s3 + $0x30] sm:$0xff] }
  0x14   : > { %426 = vmatprep.mubr.msk.bf16.mxu1 %vm184_vm0, %v168_v17  ;;  %v161_v25 = vld [vmem:[%s513_s3 + $0x68] sm:$0xff]  ;;  %v166_v28 = vpack.c.bf16 %v153_v23, %v152_v22  ;;  %v155_v31 = vld [vmem:[%s513_s3 + $0x38] sm:$0xff]  ;;  %v162_v32 = vld [vmem:[%s513_s3 + $0x70] sm:$0xff] }
  0x15   : > { %417 = vmatpush3.bf16.msra.mxu0 %v183_v16  ;;  %441 = vmatpush3.bf16.msra.mxu1 %v183_v16  ;;  %v170_v29 = vpack.c.bf16 %v161_v25, %v160_v24  ;;  %v163_v33 = vld [vmem:[%s513_s3 + $0x78] sm:$0xff]  ;;  %v167_v34 = vpack.c.bf16 %v155_v31, %v154_v30 }
  0x16   : > { %v171_v35 = vpack.c.bf16 %v163_v33, %v162_v32 }
  0x18   : > { %419 = vmatmul.mubr.msk.bf16.vlgmr.msra.gmra.mrb[0].mxu0 %vm184_vm0, %v165_v26  ;;  %427 = vmatmul.mubr.msk.bf16.vlgmr.msra.gmra.mrb[0].mxu1 %vm184_vm0, %v169_v27 }
  0x19   : > { %422 = vmatprep.mubr.msk.bf16.mxu0 %vm184_vm0, %v166_v28  ;;  %430 = vmatprep.mubr.msk.bf16.mxu1 %vm184_vm0, %v170_v29 }
  0x20   : > { %423 = vmatmul.mubr.msk.bf16.gmra.mrb[4].mxu0 %vm184_vm0, %v167_v34  ;;  %431 = vmatmul.mubr.msk.bf16.gmra.mrb[4].mxu1 %vm184_vm0, %v171_v35 }
  0xeb   : > { %v420_v36 = vpop.f32.mrb[0].mxu0  ;;  %v428_v37 = vpop.f32.mrb[0].mxu1 }
  0xec   : > { %309 = vst.msk [vmem:[%s544_s6 + $0x10] sm:$0xff] %vm306_vm1, %v420_v36  ;;  %317 = vst.msk [vmem:[%s544_s6 + $0x50] sm:$0xff] %vm306_vm1, %v428_v37  ;;  %v243_v38 = vpop.f32.mrb[1].mxu0  ;;  %v275_v39 = vpop.f32.mrb[1].mxu1 }
  0xed   : > { %307 = vst.msk [vmem:[%s544_s6] sm:$0xff] %vm306_vm1, %v243_v38  ;;  %315 = vst.msk [vmem:[%s544_s6 + $0x40] sm:$0xff] %vm306_vm1, %v275_v39  ;;  %v421_v40 = vpop.f32.mrb[2].mxu0  ;;  %v429_v41 = vpop.f32.mrb[2].mxu1 }
  0xee   : > { %310 = vst.msk [vmem:[%s544_s6 + $0x18] sm:$0xff] %vm306_vm1, %v421_v40  ;;  %318 = vst.msk [vmem:[%s544_s6 + $0x58] sm:$0xff] %vm306_vm1, %v429_v41  ;;  %v246_v42 = vpop.f32.mrb[3].mxu0  ;;  %v278_v43 = vpop.f32.mrb[3].mxu1 }
  0xef   : > { %308 = vst.msk [vmem:[%s544_s6 + $0x8] sm:$0xff] %vm306_vm1, %v246_v42  ;;  %316 = vst.msk [vmem:[%s544_s6 + $0x48] sm:$0xff] %vm306_vm1, %v278_v43 }
  0xf3   : > { %v424_v44 = vpop.f32.mrb[4].mxu0  ;;  %v432_v45 = vpop.f32.mrb[4].mxu1 }
  0xf4   : > { %313 = vst.msk [vmem:[%s544_s6 + $0x30] sm:$0xff] %vm306_vm1, %v424_v44  ;;  %321 = vst.msk [vmem:[%s544_s6 + $0x70] sm:$0xff] %vm306_vm1, %v432_v45  ;;  %v259_v46 = vpop.f32.mrb[5].mxu0  ;;  %v291_v47 = vpop.f32.mrb[5].mxu1 }
  0xf5   : > { %311 = vst.msk [vmem:[%s544_s6 + $0x20] sm:$0xff] %vm306_vm1, %v259_v46  ;;  %319 = vst.msk [vmem:[%s544_s6 + $0x60] sm:$0xff] %vm306_vm1, %v291_v47  ;;  %v425_v48 = vpop.f32.mrb[6].mxu0  ;;  %v433_v49 = vpop.f32.mrb[6].mxu1 }
  0xf6   : > { %314 = vst.msk [vmem:[%s544_s6 + $0x38] sm:$0xff] %vm306_vm1, %v425_v48  ;;  %322 = vst.msk [vmem:[%s544_s6 + $0x78] sm:$0xff] %vm306_vm1, %v433_v49  ;;  %v262_v50 = vpop.f32.mrb[7].mxu0  ;;  %v294_v51 = vpop.f32.mrb[7].mxu1 }
  0xf7   : > { %312 = vst.msk [vmem:[%s544_s6 + $0x28] sm:$0xff] %vm306_vm1, %v262_v50  ;;  %320 = vst.msk [vmem:[%s544_s6 + $0x68] sm:$0xff] %vm306_vm1, %v294_v51 }
  0xf8 PF: > { %s12_s9 = sadd.s32 1, %s456_s9  }
  0xf9   : > { %p9_p4 = scmp.ge.s32.totalorder %s12_s9, 4  }
  0xfb   :  { %11 = sbr.rel (!%p9_p4) target bundleno = 1 (0x1), region = 58 }

</bundles_post_ra>
